<compile_context>
chip_gen: v6e
topology: v6e:2x2x1
jax: 0.10.0
libtpu: 0.0.40
codegen_flags: <defaults>
</compile_context>

<pallas_src>
import jax
import jax.numpy as jnp
import numpy as np
from jax.experimental import pallas as pl
from jax.experimental.pallas import tpu as pltpu

LATENT_DIM = 100
H1 = 128
H2 = 256
OUT = 28 * 28            # 784 = 6*128 + 16 -> 6 full vregs + 1 masked store per row


def _round_up(x, m):
    return ((x + m - 1) // m) * m


def _choose_tm(batch):
    """Batch tile: as large as possible (<=512) but >=2 tiles for v7x megacore."""
    tm = min(512, _round_up(batch, 8))
    if _round_up(batch, 8) // tm < 2 and batch >= 16:
        tm = max(8, _round_up(_round_up(batch, 8) // 2, 8))
    return tm


def generator_kernel(z_ref, w1_ref, b1_ref, w2_ref, b2_ref, w3_ref, b3_ref, o_ref):
    """One batch tile: 3 back-to-back MXU matmuls, bf16 operands, f32 accum.

    Bias add / ReLU / Tanh stay in f32 on the VPU/EUP (v5e has no bf16 VPU);
    the final cast to bf16 happens only at the store.
    """
    z = z_ref[...].astype(jnp.bfloat16)                       # (TM, 100)

    h1 = jnp.dot(z, w1_ref[...], preferred_element_type=jnp.float32)
    h1 = jnp.maximum(h1 + b1_ref[...], 0.0)                   # f32 (TM, 128)

    h2 = jnp.dot(h1.astype(jnp.bfloat16), w2_ref[...],
                 preferred_element_type=jnp.float32)
    h2 = jnp.maximum(h2 + b2_ref[...], 0.0)                   # f32 (TM, 256)

    h3 = jnp.dot(h2.astype(jnp.bfloat16), w3_ref[...],
                 preferred_element_type=jnp.float32)          # f32 (TM, 784)
    o_ref[...] = jnp.tanh(h3 + b3_ref[...]).astype(o_ref.dtype)   # bf16 store


def prepare_params(params):
    """One-time prep: cast weights to bf16 (natural shapes), keep biases f32."""
    w1, b1, w2, b2, w3, b3 = params
    return (w1.astype(jnp.bfloat16), b1.astype(jnp.float32),
            w2.astype(jnp.bfloat16), b2.astype(jnp.float32),
            w3.astype(jnp.bfloat16), b3.astype(jnp.float32))


def generator_forward(z, prepared_params):
    """z: (B, LATENT_DIM) f32; prepared_params from prepare_params().

    Returns (B, 784) bfloat16 (upcast downstream if f32 is required).
    """
    w1, b1, w2, b2, w3, b3 = prepared_params
    B = z.shape[0]
    tm = _choose_tm(B)
    n_tiles = pl.cdiv(B, tm)
    B_pad = n_tiles * tm
    if B_pad != B:
        z = jnp.pad(z, ((0, B_pad - B), (0, 0)))              # rows only, small

    param_bytes = (LATENT_DIM * H1 + H1 * H2 + H2 * OUT) * 2 + (H1 + H2 + OUT) * 4
    cost = pl.CostEstimate(
        flops=2 * B_pad * (LATENT_DIM * H1 + H1 * H2 + H2 * OUT),
        transcendentals=B_pad * OUT,
        bytes_accessed=B_pad * LATENT_DIM * 4 + param_bytes + B_pad * OUT * 2,
    )

    out = pl.pallas_call(
        generator_kernel,
        out_shape=jax.ShapeDtypeStruct((B_pad, OUT), jnp.bfloat16),
        grid=(n_tiles,),
        in_specs=[
            pl.BlockSpec((tm, LATENT_DIM), lambda i: (i, 0)),  # z tile per step (f32)
            pl.BlockSpec((LATENT_DIM, H1), lambda i: (0, 0)),  # weights/biases:
            pl.BlockSpec((1, H1), lambda i: (0, 0)),           # constant index_maps
            pl.BlockSpec((H1, H2), lambda i: (0, 0)),           # -> DMA'd once,
            pl.BlockSpec((1, H2), lambda i: (0, 0)),            #    VMEM-resident
            pl.BlockSpec((H2, OUT), lambda i: (0, 0)),
            pl.BlockSpec((1, OUT), lambda i: (0, 0)),
        ],
        out_specs=pl.BlockSpec((tm, OUT), lambda i: (i, 0)),
        compiler_params=pltpu.CompilerParams(
            dimension_semantics=("parallel",),   # batch tiles shard across TCs (v7x)
            vmem_limit_bytes=32 << 20,           # ~8 MiB working set at tm=512
        ),
        cost_estimate=cost,
    )(z, w1, b1, w2, b2, w3, b3)

    return out[:B] if B_pad != B else out


def init_params(key):
    """Deterministic init mimicking PyTorch nn.Linear default (U[-1/sqrt(fan_in), +])."""
    def linear(key, fan_in, fan_out):
        kw, kb = jax.random.split(key)
        bound = 1.0 / np.sqrt(fan_in)
        w = jax.random.uniform(kw, (fan_in, fan_out), jnp.float32, -bound, bound)
        b = jax.random.uniform(kb, (1, fan_out), jnp.float32, -bound, bound)
        return w, b

    k1, k2, k3 = jax.random.split(key, 3)
    w1, b1 = linear(k1, LATENT_DIM, H1)
    w2, b2 = linear(k2, H1, H2)
    w3, b3 = linear(k3, H2, OUT)
    return (w1, b1, w2, b2, w3, b3)


def reference_forward(z, params):
    """Pure-JAX reference matching the kernel's numerics (bf16 operands, f32 accum)."""
    w1, b1, w2, b2, w3, b3 = params

    def mm(x, w):
        return jnp.dot(x.astype(jnp.bfloat16), w.astype(jnp.bfloat16),
                       preferred_element_type=jnp.float32)

    h1 = jnp.maximum(mm(z, w1) + b1, 0.0)
    h2 = jnp.maximum(mm(h1, w2) + b2, 0.0)
    return jnp.tanh(mm(h2, w3) + b3)


if __name__ == "__main__":
    key = jax.random.PRNGKey(0)
    kz, kp = jax.random.split(key)
    B = 2
    z = jax.random.normal(kz, (B, LATENT_DIM), jnp.float32)
    params = init_params(kp)
    prepared = prepare_params(params)          # one-time pad/cast, not per call

    out = generator_forward(z, prepared)
    out = jax.block_until_ready(out)

    ref = reference_forward(z, params)
    assert out.shape == (B, OUT), out.shape
    assert out.dtype == jnp.bfloat16, out.dtype
    np.testing.assert_allclose(np.asarray(out.astype(jnp.float32)),
                               np.asarray(ref), rtol=2e-2, atol=2e-2)
    print("KERNEL_OK")
</pallas_src>

<mosaic_0001>
module attributes {stable_mosaic.version = 11 : i64} {
  func.func @generator_kernel(%arg0: i32, %arg1: memref<8x100xf32, #tpu.memory_space<vmem>>, %arg2: memref<100x128xbf16, #tpu.memory_space<vmem>>, %arg3: memref<1x128xf32, #tpu.memory_space<vmem>>, %arg4: memref<128x256xbf16, #tpu.memory_space<vmem>>, %arg5: memref<1x256xf32, #tpu.memory_space<vmem>>, %arg6: memref<256x784xbf16, #tpu.memory_space<vmem>>, %arg7: memref<1x784xf32, #tpu.memory_space<vmem>>, %arg8: memref<8x784xbf16, #tpu.memory_space<vmem>>) attributes {dimension_semantics = [#tpu.dimension_semantics<parallel>], iteration_bounds = array<i64: 1>, scalar_prefetch = 0 : i64, scratch_operands = 0 : i64, tpu.core_type = #tpu.core_type<tc>, window_params = [{transform_indices = @transform_0, window_bounds = array<i64: 8, 100>}, {pipeline_mode = #tpu.pipeline_mode<synchronous>, transform_indices = @transform_1, window_bounds = array<i64: 100, 128>}, {pipeline_mode = #tpu.pipeline_mode<synchronous>, transform_indices = @transform_2, window_bounds = array<i64: 1, 128>}, {pipeline_mode = #tpu.pipeline_mode<synchronous>, transform_indices = @transform_3, window_bounds = array<i64: 128, 256>}, {pipeline_mode = #tpu.pipeline_mode<synchronous>, transform_indices = @transform_4, window_bounds = array<i64: 1, 256>}, {pipeline_mode = #tpu.pipeline_mode<synchronous>, transform_indices = @transform_5, window_bounds = array<i64: 256, 784>}, {pipeline_mode = #tpu.pipeline_mode<synchronous>, transform_indices = @transform_6, window_bounds = array<i64: 1, 784>}, {transform_indices = @transform_7, window_bounds = array<i64: 8, 784>}]} {
    %c0 = arith.constant 0 : index
    %c0_0 = arith.constant 0 : index
    %0 = vector.load %arg1[%c0, %c0_0] : memref<8x100xf32, #tpu.memory_space<vmem>>, vector<8x100xf32>
    %1 = arith.truncf %0 : vector<8x100xf32> to vector<8x100xbf16>
    %c0_1 = arith.constant 0 : index
    %c0_2 = arith.constant 0 : index
    %2 = vector.load %arg2[%c0_1, %c0_2] : memref<100x128xbf16, #tpu.memory_space<vmem>>, vector<100x128xbf16>
    %cst = arith.constant dense<0.000000e+00> : vector<8x128xf32>
    %3 = tpu.matmul %1, %2, %cst {dimension_numbers = #tpu.dot_dimension_numbers<[1], [0], [0], [1], [0, 0, 1, 1], [], []>} : vector<8x100xbf16>, vector<100x128xbf16>, vector<8x128xf32> -> vector<8x128xf32>
    %c0_3 = arith.constant 0 : index
    %c0_4 = arith.constant 0 : index
    %4 = vector.load %arg3[%c0_3, %c0_4] : memref<1x128xf32, #tpu.memory_space<vmem>>, vector<1x128xf32>
    %5 = vector.broadcast %4 : vector<1x128xf32> to vector<8x128xf32>
    %6 = arith.addf %3, %5 : vector<8x128xf32>
    %cst_5 = arith.constant 0.000000e+00 : f32
    %7 = vector.broadcast %cst_5 : f32 to vector<8x128xf32>
    %8 = arith.maximumf %6, %7 : vector<8x128xf32>
    %9 = arith.truncf %8 : vector<8x128xf32> to vector<8x128xbf16>
    %c0_6 = arith.constant 0 : index
    %c0_7 = arith.constant 0 : index
    %10 = vector.load %arg4[%c0_6, %c0_7] : memref<128x256xbf16, #tpu.memory_space<vmem>>, vector<128x256xbf16>
    %cst_8 = arith.constant dense<0.000000e+00> : vector<8x256xf32>
    %11 = tpu.matmul %9, %10, %cst_8 {dimension_numbers = #tpu.dot_dimension_numbers<[1], [0], [0], [1], [0, 0, 1, 1], [], []>} : vector<8x128xbf16>, vector<128x256xbf16>, vector<8x256xf32> -> vector<8x256xf32>
    %c0_9 = arith.constant 0 : index
    %c0_10 = arith.constant 0 : index
    %12 = vector.load %arg5[%c0_9, %c0_10] : memref<1x256xf32, #tpu.memory_space<vmem>>, vector<1x256xf32>
    %13 = vector.broadcast %12 : vector<1x256xf32> to vector<8x256xf32>
    %14 = arith.addf %11, %13 : vector<8x256xf32>
    %cst_11 = arith.constant 0.000000e+00 : f32
    %15 = vector.broadcast %cst_11 : f32 to vector<8x256xf32>
    %16 = arith.maximumf %14, %15 : vector<8x256xf32>
    %17 = arith.truncf %16 : vector<8x256xf32> to vector<8x256xbf16>
    %c0_12 = arith.constant 0 : index
    %c0_13 = arith.constant 0 : index
    %18 = vector.load %arg6[%c0_12, %c0_13] : memref<256x784xbf16, #tpu.memory_space<vmem>>, vector<256x784xbf16>
    %cst_14 = arith.constant dense<0.000000e+00> : vector<8x784xf32>
    %19 = tpu.matmul %17, %18, %cst_14 {dimension_numbers = #tpu.dot_dimension_numbers<[1], [0], [0], [1], [0, 0, 1, 1], [], []>} : vector<8x256xbf16>, vector<256x784xbf16>, vector<8x784xf32> -> vector<8x784xf32>
    %c0_15 = arith.constant 0 : index
    %c0_16 = arith.constant 0 : index
    %20 = vector.load %arg7[%c0_15, %c0_16] : memref<1x784xf32, #tpu.memory_space<vmem>>, vector<1x784xf32>
    %21 = vector.broadcast %20 : vector<1x784xf32> to vector<8x784xf32>
    %22 = arith.addf %19, %21 : vector<8x784xf32>
    %23 = math.tanh %22 : vector<8x784xf32>
    %24 = arith.truncf %23 : vector<8x784xf32> to vector<8x784xbf16>
    %c0_17 = arith.constant 0 : index
    %c0_18 = arith.constant 0 : index
    %25 = vector.load %arg8[%c0_17, %c0_18] : memref<8x784xbf16, #tpu.memory_space<vmem>>, vector<8x784xbf16>
    tpu.vector_store %arg8[%c0_17, %c0_18], %24 {strides = array<i32>} : memref<8x784xbf16, #tpu.memory_space<vmem>>, vector<8x784xbf16>,
    return
  }
  func.func @transform_0(%arg0: i32) -> (i32, i32) {
    %c0_i32 = arith.constant 0 : i32
    %c0_i32_0 = arith.constant 0 : i32
    return %arg0, %c0_i32 : i32, i32
  }
  func.func @transform_1(%arg0: i32) -> (i32, i32) {
    %c0_i32 = arith.constant 0 : i32
    %c0_i32_0 = arith.constant 0 : i32
    %c0_i32_1 = arith.constant 0 : i32
    return %c0_i32, %c0_i32_0 : i32, i32
  }
  func.func @transform_2(%arg0: i32) -> (i32, i32) {
    %c0_i32 = arith.constant 0 : i32
    %c0_i32_0 = arith.constant 0 : i32
    %c0_i32_1 = arith.constant 0 : i32
    return %c0_i32, %c0_i32_0 : i32, i32
  }
  func.func @transform_3(%arg0: i32) -> (i32, i32) {
    %c0_i32 = arith.constant 0 : i32
    %c0_i32_0 = arith.constant 0 : i32
    %c0_i32_1 = arith.constant 0 : i32
    return %c0_i32, %c0_i32_0 : i32, i32
  }
  func.func @transform_4(%arg0: i32) -> (i32, i32) {
    %c0_i32 = arith.constant 0 : i32
    %c0_i32_0 = arith.constant 0 : i32
    %c0_i32_1 = arith.constant 0 : i32
    return %c0_i32, %c0_i32_0 : i32, i32
  }
  func.func @transform_5(%arg0: i32) -> (i32, i32) {
    %c0_i32 = arith.constant 0 : i32
    %c0_i32_0 = arith.constant 0 : i32
    %c0_i32_1 = arith.constant 0 : i32
    return %c0_i32, %c0_i32_0 : i32, i32
  }
  func.func @transform_6(%arg0: i32) -> (i32, i32) {
    %c0_i32 = arith.constant 0 : i32
    %c0_i32_0 = arith.constant 0 : i32
    %c0_i32_1 = arith.constant 0 : i32
    return %c0_i32, %c0_i32_0 : i32, i32
  }
  func.func @transform_7(%arg0: i32) -> (i32, i32) {
    %c0_i32 = arith.constant 0 : i32
    %c0_i32_0 = arith.constant 0 : i32
    return %arg0, %c0_i32 : i32, i32
  }
}

</mosaic_0001>

<bundles_post_ra>
// kernel: tpu_custom_call.1
= control target key start
LH: loop header
LB: loop body
LE: loop exit
PB: predicated region body
PF: predicated region fallthrough
CT: control target
= control target key end

     0   :  { %v1675_v1 = vmov 0.0   ;;  %vm93_vm0 = vcmask 1041408   ;;  %vm1676_vm1 = vmmov 0   ;;  %vm89_vm2 = vcmask 818176   ;;  %s2162_s0 = inlined_call_operand.vmem [shape: f32[8,100], index: 0, kind: input, shape index: {}]   ;;  %s2163_s1 = inlined_call_operand.vmem [shape: bf16[100,128], index: 1, kind: input, shape index: {}]   ;;  %s2164_s2 = inlined_call_operand.vmem [shape: f32[1,128], index: 2, kind: input, shape index: {}]   ;;  %s2165_s3 = inlined_call_operand.vmem [shape: bf16[128,256], index: 3, kind: input, shape index: {}]   ;;  %s2166_s4 = inlined_call_operand.vmem [shape: f32[1,256], index: 4, kind: input, shape index: {}]   ;;  %s2167_s5 = inlined_call_operand.vmem [shape: bf16[256,784], index: 5, kind: input, shape index: {}]   ;;  %s2168_s6 = inlined_call_operand.vmem [shape: f32[1,784], index: 6, kind: input, shape index: {}]   ;;  %s2169_s7 = inlined_call_operand.hbm [shape: bf16[8,784], index: 7, kind: output, shape index: {}]  }
   0x1   :  { %v1448_v0 = vld [vmem:[%s2163_s1 + $0x30] ss:$0 sps:$4 sm:$0x33]   ;;  %1426 = vmatprep.subr.bf16.mxu0 %v1675_v1  ;;  %v1449_v3 = vld [vmem:[%s2163_s1 + $0x28] sm:$0xff]   ;;  %1440 = vmatprep.mubr.msk.bf16.mxu0 %vm1676_vm1, %v1675_v1  ;;  %v1450_v4 = vld [vmem:[%s2163_s1 + $0x20] sm:$0xff]  }
   0x2   :  { %v95_v2 = vsel %vm93_vm0, %v1448_v0, 0  ;;  %v1455_v5 = vld [vmem:[%s2165_s3 + $0x74] ss:$8 sps:$4 sm:$0xff]   ;;  %v1457_v6 = vld [vmem:[%s2165_s3 + $0x70] ss:$8 sps:$4 sm:$0xff]   ;;  %v1453_v14 = vld [vmem:[%s2163_s1 + $0x8] sm:$0xff]  }
   0x3   :  { %1427 = vmatpush3.bf16.msra.mxu0 %v95_v2  ;;  %v1458_v7 = vld [vmem:[%s2165_s3 + $0x64] ss:$8 sps:$4 sm:$0xff]   ;;  %v1451_v8 = vld [vmem:[%s2163_s1 + $0x18] sm:$0xff]   ;;  %247 = vmatprep.subr.bf16.mxu1 %v1455_v5  ;;  %v1460_v9 = vld [vmem:[%s2165_s3 + $0x60] ss:$8 sps:$4 sm:$0xff]  }
   0x4   :  { %1428 = vmatprep.subr.bf16.mxu0 %v1675_v1  ;;  %248 = vmatpush1.bf16.msra.mxu1 %v1457_v6  ;;  %v1461_v10 = vld [vmem:[%s2165_s3 + $0x54] ss:$8 sps:$4 sm:$0xff]   ;;  %v1463_v12 = vld [vmem:[%s2165_s3 + $0x50] ss:$8 sps:$4 sm:$0xff]   ;;  %v1464_v13 = vld [vmem:[%s2165_s3 + $0x44] ss:$8 sps:$4 sm:$0xff]  }
   0x5   :  { %249 = vmatprep.subr.bf16.mxu1 %v1458_v7  ;;  %v1452_v11 = vld [vmem:[%s2163_s1 + $0x10] sm:$0xff]   ;;  %v1466_v15 = vld [vmem:[%s2165_s3 + $0x40] ss:$8 sps:$4 sm:$0xff]   ;;  %v1470_v20 = vld [vmem:[%s2165_s3 + $0x24] ss:$8 sps:$4 sm:$0xff]  }
   0x6   :  { %v1467_v16 = vld [vmem:[%s2165_s3 + $0x34] ss:$8 sps:$4 sm:$0xff]   ;;  %v1454_v17 = vld [vmem:[%s2163_s1] sm:$0xff]   ;;  %v1469_v19 = vld [vmem:[%s2165_s3 + $0x30] ss:$8 sps:$4 sm:$0xff]  }
   0x7   :  { %1429 = vmatpush3.bf16.msra.mxu0 %v1449_v3  ;;  %v28_v18 = vld [vmem:[%s2162_s0] sm:$0xff]  ;;  %v1473_v23 = vld [vmem:[%s2165_s3 + $0x14] ss:$8 sps:$4 sm:$0xff]  }
   0x8   :  { %1430 = vmatprep.subr.bf16.mxu0 %v1675_v1  ;;  %250 = vmatpush1.bf16.msra.mxu1 %v1460_v9  ;;  %v1472_v21 = vld [vmem:[%s2165_s3 + $0x20] ss:$8 sps:$4 sm:$0xff]   ;;  %v29_v22 = vpack.c.bf16 %v28_v18, %v28_v18 }
   0x9   :  { %251 = vmatprep.subr.bf16.mxu1 %v1461_v10 }
   0xb   :  { %1431 = vmatpush3.bf16.msra.mxu0 %v1450_v4 }
   0xc   :  { %1432 = vmatprep.subr.bf16.mxu0 %v1675_v1  ;;  %252 = vmatpush1.bf16.msra.mxu1 %v1463_v12 }
   0xd   :  { %253 = vmatprep.subr.bf16.mxu1 %v1464_v13 }
   0xf   :  { %1433 = vmatpush3.bf16.msra.mxu0 %v1451_v8 }
  0x10   :  { %1434 = vmatprep.subr.bf16.mxu0 %v1675_v1  ;;  %254 = vmatpush1.bf16.msra.mxu1 %v1466_v15 }
  0x11   :  { %255 = vmatprep.subr.bf16.mxu1 %v1467_v16 }
  0x13   :  { %1435 = vmatpush3.bf16.msra.mxu0 %v1452_v11 }
  0x14   :  { %1436 = vmatprep.subr.bf16.mxu0 %v1675_v1  ;;  %256 = vmatpush1.bf16.msra.mxu1 %v1469_v19 }
  0x15   :  { %257 = vmatprep.subr.bf16.mxu1 %v1470_v20 }
  0x17   :  { %1437 = vmatpush3.bf16.msra.mxu0 %v1453_v14 }
  0x18   :  { %1438 = vmatprep.subr.bf16.mxu0 %v1675_v1  ;;  %258 = vmatpush1.bf16.msra.mxu1 %v1472_v21 }
  0x19   :  { %259 = vmatprep.subr.bf16.mxu1 %v1473_v23 }
  0x1b   :  { %1439 = vmatpush3.bf16.msra.mxu0 %v1454_v17 }
  0x1e   :  { %1441 = vmatmul.mubr.msk.bf16.vlgmr.msra.gmra.mxu0 %vm89_vm2, %v29_v22 }
  0x1f   :  { %12 = vsyncpa [#allocation3], 0  ;;  %v1475_v24 = vld [vmem:[%s2165_s3 + $0x10] ss:$8 sps:$4 sm:$0xff]   ;;  %v1476_v25 = vld [vmem:[%s2165_s3 + $0x4] ss:$8 sps:$4 sm:$0xff]  }
  0x20   :  { %260 = vmatpush1.bf16.msra.mxu1 %v1475_v24  ;;  %v1478_v26 = vld [vmem:[%s2165_s3] ss:$8 sps:$4 sm:$0xff]   ;;  %v1677_v27 = vmov 0   ;;  %v1484_v30 = vld [vmem:[%s2167_s5 + $0x194] ss:$28 sps:$4 sm:$0xff]   ;;  %vm1235_vm3 = vcmask 125952  }
  0x21   :  { %261 = vmatprep.subr.bf16.mxu1 %v1476_v25  ;;  %279 = vmatprep.mubr.bf16.mxu1 %v1677_v27  ;;  %v1479_v28 = vld [vmem:[%s2167_s5 + $0x188] ss:$28 sps:$4 sm:$0xff]   ;;  %v1487_v31 = vld [vmem:[%s2167_s5 + $0x154] ss:$28 sps:$4 sm:$0xff]   ;;  %v1493_v33 = vld [vmem:[%s2167_s5 + $0x11c] ss:$28 sps:$4 sm:$0xff]  }
  0x22   :  { %v1481_v29 = vld [vmem:[%s2167_s5 + $0x18c] ss:$28 sps:$4 sm:$0xff]   ;;  %v1491_v34 = vld [vmem:[%s2167_s5 + $0x118] ss:$28 sps:$4 sm:$0xff]   ;;  %v1499_v35 = vld [vmem:[%s2167_s5 + $0xe4] ss:$28 sps:$4 sm:$0xff]  }
  0x23   :  { %1033 = vmatprep.subr.bf16.mxu0 %v1481_v29  ;;  %v1485_v32 = vld [vmem:[%s2167_s5 + $0x150] ss:$28 sps:$4 sm:$0xff]   ;;  %v1497_v36 = vld [vmem:[%s2167_s5 + $0xe0] ss:$28 sps:$4 sm:$0xff]   ;;  %v1503_v38 = vld [vmem:[%s2167_s5 + $0xa8] ss:$28 sps:$4 sm:$0xff]  }
  0x24   :  { %262 = vmatpush1.bf16.msra.mxu1 %v1478_v26  ;;  %1034 = vmatpush1.bf16.msra.mxu0 %v1479_v28  ;;  %v1505_v37 = vld [vmem:[%s2167_s5 + $0xac] ss:$28 sps:$4 sm:$0xff]   ;;  %v1511_v39 = vld [vmem:[%s2167_s5 + $0x74] ss:$28 sps:$4 sm:$0xff]   ;;  %v1517_v41 = vld [vmem:[%s2167_s5 + $0x3c] ss:$28 sps:$4 sm:$0xff]  }
  0x25   :  { %1074 = vmatprep.subr.bf16.mxu1 %v1484_v30  ;;  %1035 = vmatprep.subr.bf16.mxu0 %v1487_v31  ;;  %v1509_v40 = vld [vmem:[%s2167_s5 + $0x70] ss:$28 sps:$4 sm:$0xff]   ;;  %v1515_v42 = vld [vmem:[%s2167_s5 + $0x38] ss:$28 sps:$4 sm:$0xff]   ;;  %v1523_v43 = vld [vmem:[%s2167_s5 + $0x4] ss:$28 sps:$4 sm:$0xff]  }
  0x26   :  { %v1521_v44 = vld [vmem:[%s2167_s5] ss:$28 sps:$4 sm:$0xff]   ;;  %v1529_v45 = vld [vmem:[%s2167_s5 + $0x34c] ss:$28 sps:$4 sm:$0xff]   ;;  %v1535_v47 = vld [vmem:[%s2167_s5 + $0x314] ss:$28 sps:$4 sm:$0xff]  }
  0x27   :  { %v1527_v46 = vld [vmem:[%s2167_s5 + $0x348] ss:$28 sps:$4 sm:$0xff]   ;;  %v1533_v48 = vld [vmem:[%s2167_s5 + $0x310] ss:$28 sps:$4 sm:$0xff]   ;;  %v1541_v49 = vld [vmem:[%s2167_s5 + $0x2dc] ss:$28 sps:$4 sm:$0xff]  }
  0x28   :  { %1036 = vmatpush1.bf16.msra.mxu0 %v1485_v32  ;;  %v1539_v50 = vld [vmem:[%s2167_s5 + $0x2d8] ss:$28 sps:$4 sm:$0xff]   ;;  %v1547_v51 = vld [vmem:[%s2167_s5 + $0x2a4] ss:$28 sps:$4 sm:$0xff]   ;;  %v1553_v53 = vld [vmem:[%s2167_s5 + $0x26c] ss:$28 sps:$4 sm:$0xff]  }
  0x29   :  { %1037 = vmatprep.subr.bf16.mxu0 %v1493_v33  ;;  %v1545_v52 = vld [vmem:[%s2167_s5 + $0x2a0] ss:$28 sps:$4 sm:$0xff]   ;;  %v1551_v54 = vld [vmem:[%s2167_s5 + $0x268] ss:$28 sps:$4 sm:$0xff]   ;;  %v1559_v55 = vld [vmem:[%s2167_s5 + $0x234] ss:$28 sps:$4 sm:$0xff]  }
  0x2a   :  { %v1557_v56 = vld [vmem:[%s2167_s5 + $0x230] ss:$28 sps:$4 sm:$0xff]   ;;  %v1251_v57 = vld [vmem:[%s2164_s2] ss:$0 sm:$0xff]  ;;  %v1490_v1 = vld [vmem:[%s2167_s5 + $0x15c] ss:$28 sps:$4 sm:$0xff]  }
  0x2b   :  { %v1482_v63 = vld [vmem:[%s2167_s5 + $0x190] ss:$28 sps:$4 sm:$0xff]   ;;  %v1488_v3 = vld [vmem:[%s2167_s5 + $0x158] ss:$28 sps:$4 sm:$0xff]   ;;  %v1496_v4 = vld [vmem:[%s2167_s5 + $0x124] ss:$28 sps:$4 sm:$0xff]  }
  0x2c   :  { %1038 = vmatpush1.bf16.msra.mxu0 %v1491_v34  ;;  %v1494_v5 = vld [vmem:[%s2167_s5 + $0x120] ss:$28 sps:$4 sm:$0xff]   ;;  %v1502_v6 = vld [vmem:[%s2167_s5 + $0xec] ss:$28 sps:$4 sm:$0xff]   ;;  %v1508_v8 = vld [vmem:[%s2167_s5 + $0xb4] ss:$28 sps:$4 sm:$0xff]  }
  0x2d   :  { %1039 = vmatprep.subr.bf16.mxu0 %v1499_v35  ;;  %v1500_v7 = vld [vmem:[%s2167_s5 + $0xe8] ss:$28 sps:$4 sm:$0xff]   ;;  %v1506_v9 = vld [vmem:[%s2167_s5 + $0xb0] ss:$28 sps:$4 sm:$0xff]   ;;  %v1514_v10 = vld [vmem:[%s2167_s5 + $0x7c] ss:$28 sps:$4 sm:$0xff]  }
  0x2e   :  { %v1512_v11 = vld [vmem:[%s2167_s5 + $0x78] ss:$28 sps:$4 sm:$0xff]   ;;  %v1520_v12 = vld [vmem:[%s2167_s5 + $0x44] ss:$28 sps:$4 sm:$0xff]   ;;  %v1526_v14 = vld [vmem:[%s2167_s5 + $0xc] ss:$28 sps:$4 sm:$0xff]  }
  0x2f   :  { %v1518_v13 = vld [vmem:[%s2167_s5 + $0x40] ss:$28 sps:$4 sm:$0xff]   ;;  %v1524_v15 = vld [vmem:[%s2167_s5 + $0x8] ss:$28 sps:$4 sm:$0xff]   ;;  %v1532_v16 = vld [vmem:[%s2167_s5 + $0x354] ss:$28 sps:$4 sm:$0xff]  }
  0x30   :  { %1040 = vmatpush1.bf16.msra.mxu0 %v1497_v36  ;;  %v1530_v17 = vld [vmem:[%s2167_s5 + $0x350] ss:$28 sps:$4 sm:$0xff]   ;;  %v1538_v18 = vld [vmem:[%s2167_s5 + $0x31c] ss:$28 sps:$4 sm:$0xff]   ;;  %v1544_v20 = vld [vmem:[%s2167_s5 + $0x2e4] ss:$28 sps:$4 sm:$0xff]  }
  0x31   :  { %1041 = vmatprep.subr.bf16.mxu0 %v1505_v37  ;;  %v1536_v19 = vld [vmem:[%s2167_s5 + $0x318] ss:$28 sps:$4 sm:$0xff]   ;;  %v1542_v21 = vld [vmem:[%s2167_s5 + $0x2e0] ss:$28 sps:$4 sm:$0xff]   ;;  %v1550_v22 = vld [vmem:[%s2167_s5 + $0x2ac] ss:$28 sps:$4 sm:$0xff]  }
  0x32   :  { %v1548_v23 = vld [vmem:[%s2167_s5 + $0x2a8] ss:$28 sps:$4 sm:$0xff]   ;;  %v1556_v24 = vld [vmem:[%s2167_s5 + $0x274] ss:$28 sps:$4 sm:$0xff]   ;;  %v1562_v26 = vld [vmem:[%s2167_s5 + $0x23c] ss:$28 sps:$4 sm:$0xff]  }
  0x33   :  { %v1554_v25 = vld [vmem:[%s2167_s5 + $0x270] ss:$28 sps:$4 sm:$0xff]   ;;  %v1560_v27 = vld [vmem:[%s2167_s5 + $0x238] ss:$28 sps:$4 sm:$0xff]   ;;  %v1568_v29 = vld [vmem:[%s2167_s5 + $0x204] ss:$28 sps:$4 sm:$0xff]  }
  0x34   :  { %1042 = vmatpush1.bf16.msra.mxu0 %v1503_v38  ;;  %v1565_v28 = vld [vmem:[%s2167_s5 + $0x1fc] ss:$28 sps:$4 sm:$0xff]   ;;  %v1571_v32 = vld [vmem:[%s2167_s5 + $0x1c4] ss:$28 sps:$4 sm:$0xff]   ;;  %v1574_v33 = vld [vmem:[%s2167_s5 + $0x1cc] ss:$28 sps:$4 sm:$0xff]   ;;  %v157_v38 = vlaneseq }
  0x35   :  { %1043 = vmatprep.subr.bf16.mxu0 %v1511_v39  ;;  %v1563_v30 = vld [vmem:[%s2167_s5 + $0x1f8] ss:$28 sps:$4 sm:$0xff]   ;;  %v1566_v31 = vld [vmem:[%s2167_s5 + $0x200] ss:$28 sps:$4 sm:$0xff]   ;;  %v1572_v35 = vld [vmem:[%s2167_s5 + $0x1c8] ss:$28 sps:$4 sm:$0xff]  }
  0x36   :  { %v1569_v34 = vld [vmem:[%s2167_s5 + $0x1c0] ss:$28 sps:$4 sm:$0xff]   ;;  %v1992_v39 = vshrl.u32 %v157_v38, 7 }
  0x37   :  { %v1577_v36 = vld [vmem:[%s2167_s5 + $0x19c] ss:$28 sps:$4 sm:$0xff]   ;;  %v420_v38 = vld [vmem:[%s2168_s6] sm:$0x7f] }
  0x38   :  { %1044 = vmatpush1.bf16.msra.mxu0 %v1509_v40  ;;  %v1578_v37 = vld [vmem:[%s2167_s5 + $0x360] ss:$28 sps:$4 sm:$0xff]   ;;  %v159_v40 = vsub.s32 0, %v1992_v39 }
  0x39   :  { %1045 = vmatprep.subr.bf16.mxu0 %v1517_v41  ;;  %v155_v41 = vld [vmem:[%s2166_s4] sm:$0x3] }
  0x3c   :  { %1046 = vmatpush1.bf16.msra.mxu0 %v1515_v42  ;;  %v163_v42 = vsub.s32 1, %v1992_v39 }
  0x3d   :  { %1047 = vmatprep.subr.bf16.mxu0 %v1523_v43  ;;  %v160_v43 = vrot.slane %v155_v41, %v159_v40 }
  0x40   :  { %1048 = vmatpush1.bf16.msra.mxu0 %v1521_v44  ;;  %v164_v44 = vrot.slane %v155_v41, %v163_v42  ;;  %v436_v41 = vsub.s32 3, %v1992_v39 }
  0x41   :  { %1049 = vmatprep.subr.bf16.mxu0 %v1529_v45 }
  0x44   :  { %1050 = vmatpush2.bf16.msra.mxu0 %v1527_v46 }
  0x45   :  { %1051 = vmatprep.subr.bf16.mxu0 %v1535_v47 }
  0x48   :  { %1052 = vmatpush2.bf16.msra.mxu0 %v1533_v48 }
  0x49   :  { %1053 = vmatprep.subr.bf16.mxu0 %v1541_v49 }
  0x4c   :  { %1054 = vmatpush2.bf16.msra.mxu0 %v1539_v50 }
  0x4d   :  { %1055 = vmatprep.subr.bf16.mxu0 %v1547_v51 }
  0x50   :  { %1056 = vmatpush2.bf16.msra.mxu0 %v1545_v52 }
  0x51   :  { %1057 = vmatprep.subr.bf16.mxu0 %v1553_v53 }
  0x54   :  { %1058 = vmatpush2.bf16.msra.mxu0 %v1551_v54  ;;  %v1575_v54 = vld [vmem:[%s2167_s5 + $0x198] ss:$28 sps:$4 sm:$0xff]  }
  0x55   :  { %1059 = vmatprep.subr.bf16.mxu0 %v1559_v55  ;;  %v1579_v55 = vld [vmem:[%s2167_s5 + $0x1a0] ss:$28 sps:$4 sm:$0xff]  }
  0x58   :  { %1060 = vmatpush2.bf16.msra.mxu0 %v1557_v56 }
  0x59   :  { %1061 = vmatprep.subr.bf16.mxu0 %v1565_v28  ;;  %v1624_v28 = vld [vmem:[%s2167_s5 + $0x2b0] ss:$28 sps:$4 sm:$0xff]  }
  0x5c   :  { %1062 = vmatpush2.bf16.msra.mxu0 %v1563_v30  ;;  %v1627_v30 = vld [vmem:[%s2167_s5 + $0x278] ss:$28 sps:$4 sm:$0xff]  }
  0x5d   :  { %1063 = vmatprep.subr.bf16.mxu0 %v1571_v32  ;;  %v1630_v32 = vld [vmem:[%s2167_s5 + $0x240] ss:$28 sps:$4 sm:$0xff]  }
  0x60   :  { %1064 = vmatpush2.bf16.msra.mxu0 %v1569_v34  ;;  %v1633_v34 = vld [vmem:[%s2167_s5 + $0x208] ss:$28 sps:$4 sm:$0xff]  }
  0x61   :  { %1115 = vmatprep.subr.bf16.mxu0 %v1577_v36  ;;  %v1636_v36 = vld [vmem:[%s2167_s5 + $0x1d0] ss:$28 sps:$4 sm:$0xff]  }
  0xde   :  { %v131_v58 = vpop.f32.mrf.mxu0 }
  0xdf   :  { %v132_v59 = vadd.f32 %v1251_v57, %v131_v58  ;;  %v1582_v57 = vld [vmem:[%s2167_s5 + $0x164] ss:$28 sps:$4 sm:$0xff]  }
  0xe0   :  { %v1442_v60 = vpop.f32.mrf.mxu0  ;;  %v1583_v58 = vld [vmem:[%s2167_s5 + $0x328] ss:$28 sps:$4 sm:$0xff]  }
  0xe1   :  { %v137_v61 = vmax.f32 %v132_v59, 0.0  ;;  %v1580_v59 = vld [vmem:[%s2167_s5 + $0x160] ss:$28 sps:$4 sm:$0xff]   ;;  %v1584_v60 = vld [vmem:[%s2167_s5 + $0x168] ss:$28 sps:$4 sm:$0xff]  }
  0xe2   :  { %v134_v62 = vpop.f32.mrf.mxu0 }
  0xe3   :  { %v138_v0 = vpack.c.bf16 %v137_v61, %v137_v61  ;;  %v1587_v61 = vld [vmem:[%s2167_s5 + $0x12c] ss:$28 sps:$4 sm:$0xff]  }
  0xe4   :  { %v1443_v2 = vpop.f32.mrf.mxu0  ;;  %v1588_v62 = vld [vmem:[%s2167_s5 + $0x2f0] ss:$28 sps:$4 sm:$0xff]  }
  0xe5   :  { %280 = vmatmul.mubr.bf16.vlgmr.msra.gmra.mxu1 %v138_v0  ;;  %v1589_v0 = vld [vmem:[%s2167_s5 + $0x130] ss:$28 sps:$4 sm:$0xff]   ;;  %v1593_v2 = vld [vmem:[%s2167_s5 + $0x2b8] ss:$28 sps:$4 sm:$0xff]  }
  0xe6   :  { %1075 = vmatpush1.bf16.msra.mxu1 %v1482_v63  ;;  %v1585_v63 = vld [vmem:[%s2167_s5 + $0x128] ss:$28 sps:$4 sm:$0xff]  }
  0xe7   :  { %1076 = vmatprep.subr.bf16.mxu1 %v1490_v1  ;;  %v1592_v1 = vld [vmem:[%s2167_s5 + $0xf4] ss:$28 sps:$4 sm:$0xff]  }
  0xea   :  { %1077 = vmatpush1.bf16.msra.mxu1 %v1488_v3  ;;  %v1590_v3 = vld [vmem:[%s2167_s5 + $0xf0] ss:$28 sps:$4 sm:$0xff]  }
  0xeb   :  { %1078 = vmatprep.subr.bf16.mxu1 %v1496_v4  ;;  %v1594_v4 = vld [vmem:[%s2167_s5 + $0xf8] ss:$28 sps:$4 sm:$0xff]  }
  0xee   :  { %1079 = vmatpush1.bf16.msra.mxu1 %v1494_v5  ;;  %v1597_v5 = vld [vmem:[%s2167_s5 + $0xbc] ss:$28 sps:$4 sm:$0xff]  }
  0xef   :  { %1080 = vmatprep.subr.bf16.mxu1 %v1502_v6  ;;  %v1598_v6 = vld [vmem:[%s2167_s5 + $0x280] ss:$28 sps:$4 sm:$0xff]  }
  0xf2   :  { %1081 = vmatpush1.bf16.msra.mxu1 %v1500_v7  ;;  %v1595_v7 = vld [vmem:[%s2167_s5 + $0xb8] ss:$28 sps:$4 sm:$0xff]  }
  0xf3   :  { %1082 = vmatprep.subr.bf16.mxu1 %v1508_v8  ;;  %v1599_v8 = vld [vmem:[%s2167_s5 + $0xc0] ss:$28 sps:$4 sm:$0xff]  }
  0xf6   :  { %1083 = vmatpush1.bf16.msra.mxu1 %v1506_v9  ;;  %v1602_v9 = vld [vmem:[%s2167_s5 + $0x84] ss:$28 sps:$4 sm:$0xff]  }
  0xf7   :  { %1084 = vmatprep.subr.bf16.mxu1 %v1514_v10  ;;  %v1603_v10 = vld [vmem:[%s2167_s5 + $0x248] ss:$28 sps:$4 sm:$0xff]  }
  0xfa   :  { %1085 = vmatpush1.bf16.msra.mxu1 %v1512_v11  ;;  %v1600_v11 = vld [vmem:[%s2167_s5 + $0x80] ss:$28 sps:$4 sm:$0xff]  }
  0xfb   :  { %1086 = vmatprep.subr.bf16.mxu1 %v1520_v12  ;;  %v1604_v12 = vld [vmem:[%s2167_s5 + $0x88] ss:$28 sps:$4 sm:$0xff]  }
  0xfe   :  { %1087 = vmatpush1.bf16.msra.mxu1 %v1518_v13  ;;  %v1607_v13 = vld [vmem:[%s2167_s5 + $0x4c] ss:$28 sps:$4 sm:$0xff]  }
  0xff   :  { %1088 = vmatprep.subr.bf16.mxu1 %v1526_v14  ;;  %v1608_v14 = vld [vmem:[%s2167_s5 + $0x210] ss:$28 sps:$4 sm:$0xff]  }
 0x102   :  { %1089 = vmatpush1.bf16.msra.mxu1 %v1524_v15  ;;  %v1605_v15 = vld [vmem:[%s2167_s5 + $0x48] ss:$28 sps:$4 sm:$0xff]  }
 0x103   :  { %1090 = vmatprep.subr.bf16.mxu1 %v1532_v16  ;;  %v1609_v16 = vld [vmem:[%s2167_s5 + $0x50] ss:$28 sps:$4 sm:$0xff]  }
 0x106   :  { %1091 = vmatpush2.bf16.msra.mxu1 %v1530_v17  ;;  %v1612_v17 = vld [vmem:[%s2167_s5 + $0x14] ss:$28 sps:$4 sm:$0xff]  }
 0x107   :  { %1092 = vmatprep.subr.bf16.mxu1 %v1538_v18  ;;  %v1613_v18 = vld [vmem:[%s2167_s5 + $0x1d8] ss:$28 sps:$4 sm:$0xff]  }
 0x10a   :  { %1093 = vmatpush2.bf16.msra.mxu1 %v1536_v19  ;;  %v1610_v19 = vld [vmem:[%s2167_s5 + $0x10] ss:$28 sps:$4 sm:$0xff]  }
 0x10b   :  { %1094 = vmatprep.subr.bf16.mxu1 %v1544_v20  ;;  %v1614_v20 = vld [vmem:[%s2167_s5 + $0x18] ss:$28 sps:$4 sm:$0xff]  }
 0x10e   :  { %1095 = vmatpush2.bf16.msra.mxu1 %v1542_v21  ;;  %v1617_v21 = vld [vmem:[%s2167_s5 + $0x35c] ss:$28 sps:$4 sm:$0xff]  }
 0x10f   :  { %1096 = vmatprep.subr.bf16.mxu1 %v1550_v22  ;;  %v1615_v22 = vld [vmem:[%s2167_s5 + $0x358] ss:$28 sps:$4 sm:$0xff]  }
 0x112   :  { %1097 = vmatpush2.bf16.msra.mxu1 %v1548_v23  ;;  %v1620_v23 = vld [vmem:[%s2167_s5 + $0x324] ss:$28 sps:$4 sm:$0xff]  }
 0x113   :  { %1098 = vmatprep.subr.bf16.mxu1 %v1556_v24  ;;  %v1618_v24 = vld [vmem:[%s2167_s5 + $0x320] ss:$28 sps:$4 sm:$0xff]  }
 0x116   :  { %1099 = vmatpush2.bf16.msra.mxu1 %v1554_v25  ;;  %v1623_v25 = vld [vmem:[%s2167_s5 + $0x2ec] ss:$28 sps:$4 sm:$0xff]  }
 0x117   :  { %1100 = vmatprep.subr.bf16.mxu1 %v1562_v26  ;;  %v1621_v26 = vld [vmem:[%s2167_s5 + $0x2e8] ss:$28 sps:$4 sm:$0xff]  }
 0x11a   :  { %1101 = vmatpush2.bf16.msra.mxu1 %v1560_v27  ;;  %v1626_v27 = vld [vmem:[%s2167_s5 + $0x2b4] ss:$28 sps:$4 sm:$0xff]  }
 0x11b   :  { %1102 = vmatprep.subr.bf16.mxu1 %v1568_v29  ;;  %v1629_v29 = vld [vmem:[%s2167_s5 + $0x27c] ss:$28 sps:$4 sm:$0xff]  }
 0x11e   :  { %1103 = vmatpush2.bf16.msra.mxu1 %v1566_v31  ;;  %v1632_v31 = vld [vmem:[%s2167_s5 + $0x244] ss:$28 sps:$4 sm:$0xff]  }
 0x11f   :  { %1104 = vmatprep.subr.bf16.mxu1 %v1574_v33  ;;  %v1635_v33 = vld [vmem:[%s2167_s5 + $0x20c] ss:$28 sps:$4 sm:$0xff]  }
 0x122   :  { %1105 = vmatpush2.bf16.msra.mxu1 %v1572_v35  ;;  %v1638_v35 = vld [vmem:[%s2167_s5 + $0x1d4] ss:$28 sps:$4 sm:$0xff]   ;;  %s1678_s5 = smov [#allocation2]  }
 0x123   :  { %1404 = vmatprep.subr.bf16.mxu1 %v1578_v37  ;;  %v432_v37 = vsub.s32 2, %v1992_v39  ;;  %s1243_s6 = sshll.u32 %s1678_s5, 4  ;;  %s1244_s6 = int_to_ptr.vmem [resolvable:$true] %s1243_s6 }
 0x124   :  { %s1653_s12 = scalar_lea.vmem %s1244_s6, 448  ;;  %p1658_p1 = scmp.lt.s32.totalorder %s1244_s6, %s1244_s6 }
 0x125   :  { %p1654_p0 = scmp.ne.s32.totalorder %s1244_s6, %s1653_s12  ;;  %p1659_p2 = scmp.lt.s32.totalorder %s1653_s12, %s1653_s12 }
 0x127   :  { %p1660_p3 = por %p1659_p2, %p1658_p1 }
 0x129   :  { %p1661_p4 = pnand %p1660_p3, %p1654_p0 }
 0x1a5   :  { %v281_v45 = vpop.f32.mrf.mxu1 }
 0x1a6   :  { %v282_v46 = vadd.f32 %v281_v45, %v160_v43  ;;  %v425_v43 = vrot.slane %v420_v38, %v159_v40  ;;  %v429_v45 = vrot.slane %v420_v38, %v163_v42 }
 0x1a7   :  { %v283_v47 = vpop.f32.mrf.mxu1 }
 0x1a8   :  { %v284_v48 = vadd.f32 %v283_v47, %v164_v44  ;;  %v288_v49 = vmax.f32 %v282_v46, 0.0  ;;  %v433_v44 = vrot.slane %v420_v38, %v432_v37  ;;  %v437_v46 = vrot.slane %v420_v38, %v436_v41 }
 0x1a9   :  { %v285_v50 = vpop.f32.mrf.mxu1 }
 0x1aa   :  { %v289_v51 = vmax.f32 %v284_v48, 0.0  ;;  %v2009_v56 = vpack.c.bf16 %v288_v49, %v288_v49 }
 0x1ab   :  { %v286_v52 = vpop.f32.mrf.mxu1 }
 0x1ac   :  { %v291_v53 = vpack.c.bf16 %v289_v51, %v289_v51 }
 0x1ae   :  { %1065 = vmatprep.mubr.bf16.mxu0 %v291_v53  ;;  %1106 = vmatprep.mubr.bf16.mxu1 %v291_v53 }
 0x1af   :  { %1066 = vmatmul.mubr.bf16.vlgmr.msra.gmra.mxu0 %v2009_v56  ;;  %1107 = vmatmul.mubr.bf16.vlgmr.msra.gmra.mxu1 %v2009_v56 }
 0x1b0   :  { %1116 = vmatpush1.bf16.msra.mxu0 %v1575_v54  ;;  %1405 = vmatpush3.bf16.msra.mxu1 %v1579_v55 }
 0x1b1   :  { %1147 = vmatprep.mubr.bf16.mxu0 %v291_v53  ;;  %1188 = vmatprep.mubr.bf16.mxu1 %v291_v53 }
 0x1b2   :  { %1117 = vmatprep.subr.bf16.mxu0 %v1582_v57  ;;  %1406 = vmatprep.subr.bf16.mxu1 %v1583_v58 }
 0x1b4   :  { %1118 = vmatpush1.bf16.msra.mxu0 %v1580_v59  ;;  %1407 = vmatpush3.bf16.msra.mxu1 %v1584_v60 }
 0x1b5   :  { %1119 = vmatprep.subr.bf16.mxu0 %v1587_v61  ;;  %1408 = vmatprep.subr.bf16.mxu1 %v1588_v62 }
 0x1b8   :  { %1120 = vmatpush1.bf16.msra.mxu0 %v1585_v63  ;;  %1409 = vmatpush3.bf16.msra.mxu1 %v1589_v0  ;;  %v448_v63 = vsub.s32 6, %v1992_v39 }
 0x1b9   :  { %1121 = vmatprep.subr.bf16.mxu0 %v1592_v1  ;;  %1410 = vmatprep.subr.bf16.mxu1 %v1593_v2 }
 0x1ba   :  { %v449_v1 = vrot.slane %v420_v38, %v448_v63 }
 0x1bc   :  { %1122 = vmatpush1.bf16.msra.mxu0 %v1590_v3  ;;  %1411 = vmatpush3.bf16.msra.mxu1 %v1594_v4 }
 0x1bd   :  { %1123 = vmatprep.subr.bf16.mxu0 %v1597_v5  ;;  %1412 = vmatprep.subr.bf16.mxu1 %v1598_v6 }
 0x1c0   :  { %1124 = vmatpush1.bf16.msra.mxu0 %v1595_v7  ;;  %1413 = vmatpush3.bf16.msra.mxu1 %v1599_v8 }
 0x1c1   :  { %1125 = vmatprep.subr.bf16.mxu0 %v1602_v9  ;;  %1414 = vmatprep.subr.bf16.mxu1 %v1603_v10  ;;  %v440_v9 = vsub.s32 4, %v1992_v39  ;;  %v444_v10 = vsub.s32 5, %v1992_v39 }
 0x1c4   :  { %1126 = vmatpush1.bf16.msra.mxu0 %v1600_v11  ;;  %1415 = vmatpush3.bf16.msra.mxu1 %v1604_v12  ;;  %v441_v11 = vrot.slane %v420_v38, %v440_v9  ;;  %v445_v12 = vrot.slane %v420_v38, %v444_v10 }
 0x1c5   :  { %1127 = vmatprep.subr.bf16.mxu0 %v1607_v13  ;;  %1416 = vmatprep.subr.bf16.mxu1 %v1608_v14 }
 0x1c8   :  { %1128 = vmatpush1.bf16.msra.mxu0 %v1605_v15  ;;  %1417 = vmatpush3.bf16.msra.mxu1 %v1609_v16 }
 0x1c9   :  { %1129 = vmatprep.subr.bf16.mxu0 %v1612_v17  ;;  %1418 = vmatprep.subr.bf16.mxu1 %v1613_v18 }
 0x1cc   :  { %1130 = vmatpush1.bf16.msra.mxu0 %v1610_v19  ;;  %1419 = vmatpush3.bf16.msra.mxu1 %v1614_v20 }
 0x1cd   :  { %1131 = vmatprep.subr.bf16.mxu0 %v1617_v21 }
 0x1cf   :  { %1189 = vmatmul.mubr.bf16.vlgmr.msra.gmra.mxu1 %v2009_v56 }
 0x1d0   :  { %1132 = vmatpush2.bf16.msra.mxu0 %v1615_v22 }
 0x1d1   :  { %1133 = vmatprep.subr.bf16.mxu0 %v1620_v23 }
 0x1d4   :  { %1134 = vmatpush2.bf16.msra.mxu0 %v1618_v24 }
 0x1d5   :  { %1135 = vmatprep.subr.bf16.mxu0 %v1623_v25 }
 0x1d8   :  { %1136 = vmatpush2.bf16.msra.mxu0 %v1621_v26 }
 0x1d9   :  { %1137 = vmatprep.subr.bf16.mxu0 %v1626_v27 }
 0x1dc   :  { %1138 = vmatpush2.bf16.msra.mxu0 %v1624_v28 }
 0x1dd   :  { %1139 = vmatprep.subr.bf16.mxu0 %v1629_v29 }
 0x1e0   :  { %1140 = vmatpush2.bf16.msra.mxu0 %v1627_v30 }
 0x1e1   :  { %1141 = vmatprep.subr.bf16.mxu0 %v1632_v31 }
 0x1e4   :  { %1142 = vmatpush2.bf16.msra.mxu0 %v1630_v32 }
 0x1e5   :  { %1143 = vmatprep.subr.bf16.mxu0 %v1635_v33 }
 0x1e8   :  { %1144 = vmatpush2.bf16.msra.mxu0 %v1633_v34 }
 0x1e9   :  { %1145 = vmatprep.subr.bf16.mxu0 %v1638_v35 }
 0x1ec   :  { %1146 = vmatpush2.bf16.msra.mxu0 %v1636_v36 }
 0x1ef   :  { %1148 = vmatmul.mubr.bf16.vlgmr.msra.gmra.mxu0 %v2009_v56 }
 0x26f   :  { %v1067_v47 = vpop.f32.mrf.mxu0  ;;  %v1108_v48 = vpop.f32.mrf.mxu1 }
 0x270   :  { %v1068_v49 = vadd.f32 %v1067_v47, %v425_v43  ;;  %v1109_v50 = vadd.f32 %v1108_v48, %v433_v44 }
 0x271   :  { %v1069_v51 = vpop.f32.mrf.mxu0  ;;  %v1110_v52 = vpop.f32.mrf.mxu1 }
 0x272   :  { %1639 = vtanh.f32 %v1068_v49  ;;  %v1070_v53 = vadd.f32 %v1069_v51, %v429_v45  ;;  %v1111_v54 = vadd.f32 %v1110_v52, %v437_v46 }
 0x273   :  { %1641 = vtanh.f32 %v1109_v50  ;;  %v1071_v55 = vpop.f32.mrf.mxu0  ;;  %v1112_v56 = vpop.f32.mrf.mxu1 }
 0x274   :  { %1643 = vtanh.f32 %v1070_v53 }
 0x275   :  { %1645 = vtanh.f32 %v1111_v54  ;;  %v1072_v40 = vpop.f32.mrf.mxu0  ;;  %v1113_v57 = vpop.f32.mrf.mxu1 }
 0x27f   :  { %v1640_v58 = vpop.eup %1639 }
 0x280   :  { %v1642_v59 = vpop.eup %1641 }
 0x281   :  { %v1644_v42 = vpop.eup %1643 }
 0x282   :  { %v1646_v60 = vpop.eup %1645  ;;  %v1392_v61 = vpack.c.bf16 %v1644_v42, %v1640_v58 }
 0x283   :  { %v1393_v62 = vpack.c.bf16 %v1646_v60, %v1642_v59 }
 0x284   :  { %1232 = vst [vmem:[#allocation2] sm:$0xff] %v1392_v61 }
 0x285   :  { %1233 = vst [vmem:[#allocation2 + $0x8] sm:$0xff] %v1393_v62 }
 0x28f   :  { %v1420_v0 = vpop.f32.mrf.mxu1 }
 0x291   :  { %v1421_v2 = vpop.f32.mrf.mxu1 }
 0x292   :  { %v1422_v3 = vadd.f32 %v1421_v2, %v1420_v0 }
 0x293   :  { %v1423_v4 = vpop.f32.mrf.mxu1 }
 0x294   :  { %v1191_v5 = vadd.f32 %v1422_v3, %v449_v1 }
 0x295   :  { %v1424_v6 = vpop.f32.mrf.mxu1 }
 0x296   :  { %1647 = vtanh.f32 %v1191_v5 }
 0x2a3   :  { %v1648_v7 = vpop.eup %1647 }
 0x2a4   :  { %v1395_v8 = vpack.c.bf16 %v1648_v7, %v1648_v7 }
 0x2a6   :  { %1236 = vst.msk [vmem:[#allocation2 + $0x18] sm:$0xf] %vm1235_vm3, %v1395_v8 }
 0x2af   :  { %v1149_v13 = vpop.f32.mrf.mxu0 }
 0x2b0   :  { %v1150_v14 = vadd.f32 %v1149_v13, %v441_v11 }
 0x2b1   :  { %v1151_v15 = vpop.f32.mrf.mxu0 }
 0x2b2   :  { %v1152_v16 = vadd.f32 %v1151_v15, %v445_v12  ;;  %1649 = vtanh.f32 %v1150_v14 }
 0x2b3   :  { %v1153_v17 = vpop.f32.mrf.mxu0 }
 0x2b4   :  { %1651 = vtanh.f32 %v1152_v16 }
 0x2b5   :  { %v1154_v18 = vpop.f32.mrf.mxu0 }
 0x2bf   :  { %v1650_v19 = vpop.eup %1649 }
 0x2c1   :  { %v1652_v20 = vpop.eup %1651 }
 0x2c2   :  { %v1394_v21 = vpack.c.bf16 %v1652_v20, %v1650_v19 }
 0x2c4   :  { %1234 = vst [vmem:[#allocation2 + $0x10] sm:$0xff] %v1394_v21 }
 0x2c5   :  { %1664 = shalt.err (!%p1661_p4)
}
 0x2c6   :  { %1246 = dma.vmem_to_hbm [thread:$0]  %s1244_s6, 448, %s2169_s7, [#allocation3]  }
 0x2c7   :  { %1673 = dma.done.wait [#allocation3], 448  }
 0x2c8   :  { %1674 = vsyncadd [#allocation3], 4294966848 }
 0x2c9   :  { %1250 = vsyncpa [#allocation3], 1 }

</bundles_post_ra>
